<compile_context>
chip_gen: v7x
topology: tpu7x:2x2x1
jax: 0.10.0
libtpu: 0.0.40
codegen_flags: <defaults>
</compile_context>

<pallas_src>
import functools

import jax
import jax.numpy as jnp
from jax.experimental import pallas as pl
from jax.experimental.pallas import tpu as pltpu

LANE = 128          # pad every channel dim to the 128-lane vreg width
_BN_EPS = 1e-5


def _rup(n, m=LANE):
    return ((n + m - 1) // m) * m


def _spec2d(shape):
    # full-array 2-D block (grid=(1,)); block_shape == array shape satisfies tiling rules
    return pl.BlockSpec(shape, lambda i: (0, 0))


# ----------------------------------------------------------------------------
# Kernels
# ----------------------------------------------------------------------------

def _gine_conv_kernel(*refs, num_lins, final_relu):
    """One fused GINEConv layer.

    refs = [src(E,1), dst(1,E), x(N,C), edge_attr(E,2), w_e(2,C), b_e(1,C),
            eps(1,1 SMEM), (w_i, b_i) * num_lins, out(N,H)]
    """
    src_ref, dst_ref, x_ref, ea_ref, we_ref, be_ref, eps_ref = refs[:7]
    lin_refs = refs[7:7 + 2 * num_lins]
    o_ref = refs[7 + 2 * num_lins]

    x = x_ref[...]                                    # [N, C] f32
    n_nodes = x.shape[0]
    n_edges = ea_ref.shape[0]

    # --- gather x[src] as one-hot(src) [E,N] @ x [N,C] (one-hot built in-kernel) ---
    src = src_ref[...]                                # [E, 1] int32
    gat = jnp.where(
        jax.lax.broadcasted_iota(jnp.int32, (n_edges, n_nodes), 1) == src,
        1.0, 0.0).astype(jnp.bfloat16)
    x_src = jnp.dot(gat, x.astype(jnp.bfloat16),
                    preferred_element_type=jnp.float32)        # [E, C]

    # --- edge linear (edge_dim == 2): two VPU broadcast FMAs, no K=2 MXU dot ---
    ea = ea_ref[...]                                  # [E, 2]
    we = we_ref[...]                                  # [2, C]
    lin_e = ea[:, 0:1] * we[0:1, :] + ea[:, 1:2] * we[1:2, :] + be_ref[...]

    msg = jnp.maximum(x_src + lin_e, 0.0)             # relu(x_j + Lin(e_ij)), [E, C]

    # --- scatter-add onto dst: one-hot(dst)^T [N,E] @ msg [E,C] ---
    dst = dst_ref[...]                                # [1, E] int32
    scat = jnp.where(
        jax.lax.broadcasted_iota(jnp.int32, (n_nodes, n_edges), 0) == dst,
        1.0, 0.0).astype(jnp.bfloat16)
    agg = jnp.dot(scat, msg.astype(jnp.bfloat16),
                  preferred_element_type=jnp.float32)          # [N, C]

    # --- GINE combine + fused conv.nn MLP (eval BN folded, dropout identity) ---
    h = agg + (1.0 + eps_ref[0, 0]) * x
    for li in range(num_lins):
        w = lin_refs[2 * li][...]
        b = lin_refs[2 * li + 1][...]
        h = jnp.dot(h, w, preferred_element_type=jnp.float32) + b
        if li < num_lins - 1 or final_relu:
            h = jnp.maximum(h, 0.0)
    o_ref[...] = h


def _readout_kernel(*refs, num_reps, num_lins):
    """All readout heads fused: global_add_pool (one-hot matmul) + per-head MLP
    (BN folded) + sum over heads, in one pallas_call.

    refs = [batch(1,N), rep_0..rep_{R-1}, (w,b)*num_lins per head, out(B,O)]
    """
    batch_ref = refs[0]
    rep_refs = refs[1:1 + num_reps]
    w_refs = refs[1 + num_reps:1 + num_reps + 2 * num_lins * num_reps]
    o_ref = refs[-1]

    n_graphs = o_ref.shape[0]
    n_nodes = batch_ref.shape[1]
    pool = jnp.where(
        jax.lax.broadcasted_iota(jnp.int32, (n_graphs, n_nodes), 0) == batch_ref[...],
        1.0, 0.0).astype(jnp.bfloat16)                # [B, N]

    acc = jnp.zeros(o_ref.shape, jnp.float32)
    for r in range(num_reps):
        h = jnp.dot(pool, rep_refs[r][...].astype(jnp.bfloat16),
                    preferred_element_type=jnp.float32)        # pooled [B, C]
        base = 2 * num_lins * r
        for li in range(num_lins):
            w = w_refs[base + 2 * li][...]
            b = w_refs[base + 2 * li + 1][...]
            h = jnp.dot(h, w, preferred_element_type=jnp.float32) + b
            if li < num_lins - 1:
                h = jnp.maximum(h, 0.0)
        acc = acc + h
    o_ref[...] = acc


# ----------------------------------------------------------------------------
# Pallas wrappers
# ----------------------------------------------------------------------------

def gine_conv_layer(src_col, dst_row, x, edge_attr, conv_p):
    n_nodes = x.shape[0]
    lins = conv_p["lins"]
    h_pad = lins[-1][0].shape[1]

    inputs = [src_col, dst_row, x, edge_attr, conv_p["w_e"], conv_p["b_e"], conv_p["eps"]]
    in_specs = [
        _spec2d(src_col.shape), _spec2d(dst_row.shape), _spec2d(x.shape),
        _spec2d(edge_attr.shape), _spec2d(conv_p["w_e"].shape),
        _spec2d(conv_p["b_e"].shape),
        pl.BlockSpec(memory_space=pltpu.MemorySpace.SMEM),   # eps scalar in SMEM
    ]
    for w, b in lins:
        inputs += [w, b]
        in_specs += [_spec2d(w.shape), _spec2d(b.shape)]

    # TODO(synk): for realistic N/E, tile nodes ("parallel") x edges ("arbitrary")
    # with a VMEM f32 accumulator + pl.when init/finalize instead of grid=(1,)
    # whole-array blocks (required on v7x's 64 MiB VMEM).
    kernel = functools.partial(_gine_conv_kernel, num_lins=len(lins), final_relu=True)
    return pl.pallas_call(
        kernel,
        out_shape=jax.ShapeDtypeStruct((n_nodes, h_pad), jnp.float32),
        grid=(1,),
        in_specs=in_specs,
        out_specs=_spec2d((n_nodes, h_pad)),
        compiler_params=pltpu.CompilerParams(dimension_semantics=("arbitrary",)),
    )(*inputs)


def readout_sum(batch_row, reps, readouts, batch_size):
    num_reps = len(reps)
    num_lins = len(readouts[0])
    out_pad = readouts[0][-1][0].shape[1]

    inputs = [batch_row] + list(reps)
    in_specs = [_spec2d(batch_row.shape)] + [_spec2d(r.shape) for r in reps]
    for lins in readouts:
        for w, b in lins:
            inputs += [w, b]
            in_specs += [_spec2d(w.shape), _spec2d(b.shape)]

    kernel = functools.partial(_readout_kernel, num_reps=num_reps, num_lins=num_lins)
    return pl.pallas_call(
        kernel,
        out_shape=jax.ShapeDtypeStruct((batch_size, out_pad), jnp.float32),
        grid=(1,),
        in_specs=in_specs,
        out_specs=_spec2d((batch_size, out_pad)),
        compiler_params=pltpu.CompilerParams(dimension_semantics=("arbitrary",)),
    )(*inputs)


# ----------------------------------------------------------------------------
# Parameter init (PyTorch-like fan-in uniform) + BN folding + lane padding
# ----------------------------------------------------------------------------

def init_linear(key, c_in, c_out):
    k1, k2 = jax.random.split(key)
    bound = 1.0 / (c_in ** 0.5)
    w = jax.random.uniform(k1, (c_in, c_out), jnp.float32, -bound, bound)
    b = jax.random.uniform(k2, (c_out,), jnp.float32, -bound, bound)
    return w, b


def _fold_bn_and_pad(w, b, with_bn, c_in_pad, c_out_pad):
    c_in, c_out = w.shape
    if with_bn:
        # eval-mode BatchNorm1d at init: running mean 0, var 1, gamma 1, beta 0
        gamma = jnp.ones((c_out,), jnp.float32)
        beta = jnp.zeros((c_out,), jnp.float32)
        mean = jnp.zeros((c_out,), jnp.float32)
        var = jnp.ones((c_out,), jnp.float32)
        scale = gamma / jnp.sqrt(var + _BN_EPS)
        shift = beta - mean * scale
        w = w * scale[None, :]
        b = b * scale + shift
    w = jnp.pad(w, ((0, c_in_pad - c_in), (0, c_out_pad - c_out)))
    b = jnp.pad(b, (0, c_out_pad - c_out)).reshape(1, c_out_pad)
    return w, b


def init_mlp_folded(key, channels):
    """PyG-style MLP (plain_last=True): BN+relu+dropout after all but the last lin.
    BN is folded into w/b; channel dims are padded to the 128-lane width."""
    lins = []
    keys = jax.random.split(key, len(channels) - 1)
    for li in range(len(channels) - 1):
        w, b = init_linear(keys[li], channels[li], channels[li + 1])
        last = li == len(channels) - 2
        w, b = _fold_bn_and_pad(w, b, with_bn=not last,
                                c_in_pad=_rup(channels[li]),
                                c_out_pad=_rup(channels[li + 1]))
        lins.append((w, b))
    return lins


def init_gin_params(key, in_channels, hidden_channels, out_channels,
                    num_gin_layers, num_mlp_layers, num_mlp_readout_layers,
                    edge_dim=2):
    keys = jax.random.split(key, 3 * num_gin_layers + 1)
    kidx = 0
    convs = []
    for i in range(num_gin_layers):
        c_in = in_channels if i == 0 else hidden_channels
        w_e, b_e = init_linear(keys[kidx], edge_dim, c_in)
        kidx += 1
        w_e = jnp.pad(w_e, ((0, 0), (0, _rup(c_in) - c_in)))
        b_e = jnp.pad(b_e, (0, _rup(c_in) - c_in)).reshape(1, -1)
        mlp_channels = [c_in] + [hidden_channels] * num_mlp_layers + [hidden_channels]
        lins = init_mlp_folded(keys[kidx], mlp_channels)
        kidx += 1
        convs.append(dict(w_e=w_e, b_e=b_e,
                          eps=jnp.zeros((1, 1), jnp.float32),  # train_eps=True, init 0
                          lins=lins))
    readouts = []
    ro_channels = [in_channels] + [hidden_channels] * num_mlp_readout_layers + [out_channels]
    readouts.append(init_mlp_folded(keys[kidx], ro_channels))
    kidx += 1
    for _ in range(num_gin_layers):
        ro_channels = [hidden_channels] + [hidden_channels] * num_mlp_readout_layers + [out_channels]
        readouts.append(init_mlp_folded(keys[kidx], ro_channels))
        kidx += 1
    return dict(convs=convs, readouts=readouts)


# ----------------------------------------------------------------------------
# Forward pass
# ----------------------------------------------------------------------------

def gin_forward(params, x, edge_index, edge_attr, batch, batch_size, out_channels):
    n_nodes, c_in = x.shape
    x_pad = jnp.pad(x, ((0, 0), (0, _rup(c_in) - c_in)))          # lane-dense features
    src_col = edge_index[0].astype(jnp.int32).reshape(-1, 1)       # [E, 1]
    dst_row = edge_index[1].astype(jnp.int32).reshape(1, -1)       # [1, E]
    batch_row = batch.astype(jnp.int32).reshape(1, -1)             # [1, N]

    representations = [x_pad]
    h = x_pad
    for conv_p in params["convs"]:
        h = gine_conv_layer(src_col, dst_row, h, edge_attr, conv_p)
        representations.append(h)

    out_pad = readout_sum(batch_row, representations, params["readouts"], batch_size)
    return out_pad[:, :out_channels]


# ----------------------------------------------------------------------------
# Main
# ----------------------------------------------------------------------------

if __name__ == "__main__":
    in_channels, hidden_channels, out_channels = 4, 32, 8
    num_gin_layers, num_mlp_layers, num_mlp_readout_layers = 2, 2, 2
    N, E, B = 16, 32, 2  # nodes, edges, graphs in the batch

    root = jax.random.PRNGKey(0)
    k_param, k_x, k_src, k_dst, k_ea, k_b = jax.random.split(root, 6)

    x = jax.random.normal(k_x, (N, in_channels), jnp.float32)
    src = jax.random.randint(k_src, (E,), 0, N)
    dst = jax.random.randint(k_dst, (E,), 0, N)
    edge_index = jnp.stack([src, dst])                        # [2, E]
    edge_attr = jax.random.normal(k_ea, (E, 2), jnp.float32)  # edge_dim = 2
    batch = jnp.sort(jax.random.randint(k_b, (N,), 0, B))     # graph id per node

    params = init_gin_params(k_param, in_channels, hidden_channels, out_channels,
                             num_gin_layers, num_mlp_layers, num_mlp_readout_layers)

    out = gin_forward(params, x, edge_index, edge_attr, batch, B, out_channels)
    jax.block_until_ready(out)
    assert out.shape == (B, out_channels) and out.dtype == jnp.float32
    # TODO(synk): training-mode dropout (stochastic) and BatchNorm running-stat
    # updates are not reproduced; forward is eval-mode semantics.
    print("KERNEL_OK")
</pallas_src>

<mosaic_0001>
module attributes {stable_mosaic.version = 11 : i64} {
  func.func @_gine_conv_kernel(%arg0: i32, %arg1: memref<32x1xi32, #tpu.memory_space<vmem>>, %arg2: memref<1x32xi32, #tpu.memory_space<vmem>>, %arg3: memref<16x128xf32, #tpu.memory_space<vmem>>, %arg4: memref<32x2xf32, #tpu.memory_space<vmem>>, %arg5: memref<2x128xf32, #tpu.memory_space<vmem>>, %arg6: memref<1x128xf32, #tpu.memory_space<vmem>>, %arg7: memref<1x1xf32, #tpu.memory_space<smem>>, %arg8: memref<128x128xf32, #tpu.memory_space<vmem>>, %arg9: memref<1x128xf32, #tpu.memory_space<vmem>>, %arg10: memref<128x128xf32, #tpu.memory_space<vmem>>, %arg11: memref<1x128xf32, #tpu.memory_space<vmem>>, %arg12: memref<128x128xf32, #tpu.memory_space<vmem>>, %arg13: memref<1x128xf32, #tpu.memory_space<vmem>>, %arg14: memref<16x128xf32, #tpu.memory_space<vmem>>) attributes {dimension_semantics = [#tpu.dimension_semantics<arbitrary>], iteration_bounds = array<i64: 1>, scalar_prefetch = 0 : i64, scratch_operands = 0 : i64, tpu.core_type = #tpu.core_type<tc>, window_params = [{pipeline_mode = #tpu.pipeline_mode<synchronous>, transform_indices = @transform_0, window_bounds = array<i64: 32, 1>}, {pipeline_mode = #tpu.pipeline_mode<synchronous>, transform_indices = @transform_1, window_bounds = array<i64: 1, 32>}, {pipeline_mode = #tpu.pipeline_mode<synchronous>, transform_indices = @transform_2, window_bounds = array<i64: 16, 128>}, {pipeline_mode = #tpu.pipeline_mode<synchronous>, transform_indices = @transform_3, window_bounds = array<i64: 32, 2>}, {pipeline_mode = #tpu.pipeline_mode<synchronous>, transform_indices = @transform_4, window_bounds = array<i64: 2, 128>}, {pipeline_mode = #tpu.pipeline_mode<synchronous>, transform_indices = @transform_5, window_bounds = array<i64: 1, 128>}, {transform_indices = @transform_6, window_bounds = array<i64: 1, 1>}, {pipeline_mode = #tpu.pipeline_mode<synchronous>, transform_indices = @transform_7, window_bounds = array<i64: 128, 128>}, {pipeline_mode = #tpu.pipeline_mode<synchronous>, transform_indices = @transform_8, window_bounds = array<i64: 1, 128>}, {pipeline_mode = #tpu.pipeline_mode<synchronous>, transform_indices = @transform_9, window_bounds = array<i64: 128, 128>}, {pipeline_mode = #tpu.pipeline_mode<synchronous>, transform_indices = @transform_10, window_bounds = array<i64: 1, 128>}, {pipeline_mode = #tpu.pipeline_mode<synchronous>, transform_indices = @transform_11, window_bounds = array<i64: 128, 128>}, {pipeline_mode = #tpu.pipeline_mode<synchronous>, transform_indices = @transform_12, window_bounds = array<i64: 1, 128>}, {pipeline_mode = #tpu.pipeline_mode<synchronous>, transform_indices = @transform_13, window_bounds = array<i64: 16, 128>}]} {
    %c0 = arith.constant 0 : index
    %c0_0 = arith.constant 0 : index
    %0 = vector.load %arg3[%c0, %c0_0] : memref<16x128xf32, #tpu.memory_space<vmem>>, vector<16x128xf32>
    %c0_1 = arith.constant 0 : index
    %c0_2 = arith.constant 0 : index
    %1 = vector.load %arg1[%c0_1, %c0_2] : memref<32x1xi32, #tpu.memory_space<vmem>>, vector<32x1xi32>
    %2 = tpu.iota {dimensions = array<i32: 1>} : vector<32x16xi32>
    %3 = vector.broadcast %1 : vector<32x1xi32> to vector<32x16xi32>
    %4 = arith.cmpi eq, %2, %3 : vector<32x16xi32>
    %cst = arith.constant 1.000000e+00 : f32
    %cst_3 = arith.constant 0.000000e+00 : f32
    %5 = vector.broadcast %cst : f32 to vector<32x16xf32>
    %6 = vector.broadcast %cst_3 : f32 to vector<32x16xf32>
    %7 = arith.select %4, %5, %6 : vector<32x16xi1>, vector<32x16xf32>
    %8 = arith.truncf %7 : vector<32x16xf32> to vector<32x16xbf16>
    %9 = arith.truncf %0 : vector<16x128xf32> to vector<16x128xbf16>
    %cst_4 = arith.constant dense<0.000000e+00> : vector<32x128xf32>
    %10 = tpu.matmul %8, %9, %cst_4 {dimension_numbers = #tpu.dot_dimension_numbers<[1], [0], [0], [1], [0, 0, 1, 1], [], []>} : vector<32x16xbf16>, vector<16x128xbf16>, vector<32x128xf32> -> vector<32x128xf32>
    %c0_5 = arith.constant 0 : index
    %c0_6 = arith.constant 0 : index
    %11 = vector.load %arg4[%c0_5, %c0_6] : memref<32x2xf32, #tpu.memory_space<vmem>>, vector<32x2xf32>
    %c0_7 = arith.constant 0 : index
    %c0_8 = arith.constant 0 : index
    %12 = vector.load %arg5[%c0_7, %c0_8] : memref<2x128xf32, #tpu.memory_space<vmem>>, vector<2x128xf32>
    %13 = vector.extract_strided_slice %11 {offsets = [0, 0], sizes = [32, 1], strides = [1, 1]} : vector<32x2xf32> to vector<32x1xf32>
    %14 = vector.extract_strided_slice %12 {offsets = [0, 0], sizes = [1, 128], strides = [1, 1]} : vector<2x128xf32> to vector<1x128xf32>
    %15 = vector.broadcast %13 : vector<32x1xf32> to vector<32x128xf32>
    %16 = vector.broadcast %14 : vector<1x128xf32> to vector<32x128xf32>
    %17 = arith.mulf %15, %16 : vector<32x128xf32>
    %18 = vector.extract_strided_slice %11 {offsets = [0, 1], sizes = [32, 1], strides = [1, 1]} : vector<32x2xf32> to vector<32x1xf32>
    %19 = vector.extract_strided_slice %12 {offsets = [1, 0], sizes = [1, 128], strides = [1, 1]} : vector<2x128xf32> to vector<1x128xf32>
    %20 = vector.broadcast %18 : vector<32x1xf32> to vector<32x128xf32>
    %21 = vector.broadcast %19 : vector<1x128xf32> to vector<32x128xf32>
    %22 = arith.mulf %20, %21 : vector<32x128xf32>
    %23 = arith.addf %17, %22 : vector<32x128xf32>
    %c0_9 = arith.constant 0 : index
    %c0_10 = arith.constant 0 : index
    %24 = vector.load %arg6[%c0_9, %c0_10] : memref<1x128xf32, #tpu.memory_space<vmem>>, vector<1x128xf32>
    %25 = vector.broadcast %24 : vector<1x128xf32> to vector<32x128xf32>
    %26 = arith.addf %23, %25 : vector<32x128xf32>
    %27 = arith.addf %10, %26 : vector<32x128xf32>
    %cst_11 = arith.constant 0.000000e+00 : f32
    %28 = vector.broadcast %cst_11 : f32 to vector<32x128xf32>
    %29 = arith.maximumf %27, %28 : vector<32x128xf32>
    %c0_12 = arith.constant 0 : index
    %c0_13 = arith.constant 0 : index
    %30 = vector.load %arg2[%c0_12, %c0_13] : memref<1x32xi32, #tpu.memory_space<vmem>>, vector<1x32xi32>
    %31 = tpu.iota {dimensions = array<i32: 0>} : vector<16x32xi32>
    %32 = vector.broadcast %30 : vector<1x32xi32> to vector<16x32xi32>
    %33 = arith.cmpi eq, %31, %32 : vector<16x32xi32>
    %cst_14 = arith.constant 1.000000e+00 : f32
    %cst_15 = arith.constant 0.000000e+00 : f32
    %34 = vector.broadcast %cst_14 : f32 to vector<16x32xf32>
    %35 = vector.broadcast %cst_15 : f32 to vector<16x32xf32>
    %36 = arith.select %33, %34, %35 : vector<16x32xi1>, vector<16x32xf32>
    %37 = arith.truncf %36 : vector<16x32xf32> to vector<16x32xbf16>
    %38 = arith.truncf %29 : vector<32x128xf32> to vector<32x128xbf16>
    %cst_16 = arith.constant dense<0.000000e+00> : vector<16x128xf32>
    %39 = tpu.matmul %37, %38, %cst_16 {dimension_numbers = #tpu.dot_dimension_numbers<[1], [0], [0], [1], [0, 0, 1, 1], [], []>} : vector<16x32xbf16>, vector<32x128xbf16>, vector<16x128xf32> -> vector<16x128xf32>
    %c0_17 = arith.constant 0 : index
    %c0_18 = arith.constant 0 : index
    %40 = memref.load %arg7[%c0_17, %c0_18] : memref<1x1xf32, #tpu.memory_space<smem>>
    %cst_19 = arith.constant 1.000000e+00 : f32
    %41 = arith.addf %cst_19, %40 : f32
    %42 = vector.broadcast %41 : f32 to vector<16x128xf32>
    %43 = arith.mulf %42, %0 : vector<16x128xf32>
    %44 = arith.addf %39, %43 : vector<16x128xf32>
    %c0_20 = arith.constant 0 : index
    %c0_21 = arith.constant 0 : index
    %45 = vector.load %arg8[%c0_20, %c0_21] : memref<128x128xf32, #tpu.memory_space<vmem>>, vector<128x128xf32>
    %c0_22 = arith.constant 0 : index
    %c0_23 = arith.constant 0 : index
    %46 = vector.load %arg9[%c0_22, %c0_23] : memref<1x128xf32, #tpu.memory_space<vmem>>, vector<1x128xf32>
    %cst_24 = arith.constant dense<0.000000e+00> : vector<16x128xf32>
    %47 = tpu.matmul %44, %45, %cst_24 {dimension_numbers = #tpu.dot_dimension_numbers<[1], [0], [0], [1], [0, 0, 1, 1], [], []>} : vector<16x128xf32>, vector<128x128xf32>, vector<16x128xf32> -> vector<16x128xf32>
    %48 = vector.broadcast %46 : vector<1x128xf32> to vector<16x128xf32>
    %49 = arith.addf %47, %48 : vector<16x128xf32>
    %cst_25 = arith.constant 0.000000e+00 : f32
    %50 = vector.broadcast %cst_25 : f32 to vector<16x128xf32>
    %51 = arith.maximumf %49, %50 : vector<16x128xf32>
    %c0_26 = arith.constant 0 : index
    %c0_27 = arith.constant 0 : index
    %52 = vector.load %arg10[%c0_26, %c0_27] : memref<128x128xf32, #tpu.memory_space<vmem>>, vector<128x128xf32>
    %c0_28 = arith.constant 0 : index
    %c0_29 = arith.constant 0 : index
    %53 = vector.load %arg11[%c0_28, %c0_29] : memref<1x128xf32, #tpu.memory_space<vmem>>, vector<1x128xf32>
    %cst_30 = arith.constant dense<0.000000e+00> : vector<16x128xf32>
    %54 = tpu.matmul %51, %52, %cst_30 {dimension_numbers = #tpu.dot_dimension_numbers<[1], [0], [0], [1], [0, 0, 1, 1], [], []>} : vector<16x128xf32>, vector<128x128xf32>, vector<16x128xf32> -> vector<16x128xf32>
    %55 = vector.broadcast %53 : vector<1x128xf32> to vector<16x128xf32>
    %56 = arith.addf %54, %55 : vector<16x128xf32>
    %cst_31 = arith.constant 0.000000e+00 : f32
    %57 = vector.broadcast %cst_31 : f32 to vector<16x128xf32>
    %58 = arith.maximumf %56, %57 : vector<16x128xf32>
    %c0_32 = arith.constant 0 : index
    %c0_33 = arith.constant 0 : index
    %59 = vector.load %arg12[%c0_32, %c0_33] : memref<128x128xf32, #tpu.memory_space<vmem>>, vector<128x128xf32>
    %c0_34 = arith.constant 0 : index
    %c0_35 = arith.constant 0 : index
    %60 = vector.load %arg13[%c0_34, %c0_35] : memref<1x128xf32, #tpu.memory_space<vmem>>, vector<1x128xf32>
    %cst_36 = arith.constant dense<0.000000e+00> : vector<16x128xf32>
    %61 = tpu.matmul %58, %59, %cst_36 {dimension_numbers = #tpu.dot_dimension_numbers<[1], [0], [0], [1], [0, 0, 1, 1], [], []>} : vector<16x128xf32>, vector<128x128xf32>, vector<16x128xf32> -> vector<16x128xf32>
    %62 = vector.broadcast %60 : vector<1x128xf32> to vector<16x128xf32>
    %63 = arith.addf %61, %62 : vector<16x128xf32>
    %cst_37 = arith.constant 0.000000e+00 : f32
    %64 = vector.broadcast %cst_37 : f32 to vector<16x128xf32>
    %65 = arith.maximumf %63, %64 : vector<16x128xf32>
    %c0_38 = arith.constant 0 : index
    %c0_39 = arith.constant 0 : index
    %66 = vector.load %arg14[%c0_38, %c0_39] : memref<16x128xf32, #tpu.memory_space<vmem>>, vector<16x128xf32>
    tpu.vector_store %arg14[%c0_38, %c0_39], %65 {strides = array<i32>} : memref<16x128xf32, #tpu.memory_space<vmem>>, vector<16x128xf32>,
    return
  }
  func.func @transform_0(%arg0: i32) -> (i32, i32) {
    %c0_i32 = arith.constant 0 : i32
    %c0_i32_0 = arith.constant 0 : i32
    %c0_i32_1 = arith.constant 0 : i32
    return %c0_i32, %c0_i32_0 : i32, i32
  }
  func.func @transform_1(%arg0: i32) -> (i32, i32) {
    %c0_i32 = arith.constant 0 : i32
    %c0_i32_0 = arith.constant 0 : i32
    %c0_i32_1 = arith.constant 0 : i32
    return %c0_i32, %c0_i32_0 : i32, i32
  }
  func.func @transform_2(%arg0: i32) -> (i32, i32) {
    %c0_i32 = arith.constant 0 : i32
    %c0_i32_0 = arith.constant 0 : i32
    %c0_i32_1 = arith.constant 0 : i32
    return %c0_i32, %c0_i32_0 : i32, i32
  }
  func.func @transform_3(%arg0: i32) -> (i32, i32) {
    %c0_i32 = arith.constant 0 : i32
    %c0_i32_0 = arith.constant 0 : i32
    %c0_i32_1 = arith.constant 0 : i32
    return %c0_i32, %c0_i32_0 : i32, i32
  }
  func.func @transform_4(%arg0: i32) -> (i32, i32) {
    %c0_i32 = arith.constant 0 : i32
    %c0_i32_0 = arith.constant 0 : i32
    %c0_i32_1 = arith.constant 0 : i32
    return %c0_i32, %c0_i32_0 : i32, i32
  }
  func.func @transform_5(%arg0: i32) -> (i32, i32) {
    %c0_i32 = arith.constant 0 : i32
    %c0_i32_0 = arith.constant 0 : i32
    %c0_i32_1 = arith.constant 0 : i32
    return %c0_i32, %c0_i32_0 : i32, i32
  }
  func.func @transform_6(%arg0: i32) -> (i32, i32) {
    %c0_i32 = arith.constant 0 : i32
    %c0_i32_0 = arith.constant 0 : i32
    %c0_i32_1 = arith.constant 0 : i32
    return %c0_i32, %c0_i32_0 : i32, i32
  }
  func.func @transform_7(%arg0: i32) -> (i32, i32) {
    %c0_i32 = arith.constant 0 : i32
    %c0_i32_0 = arith.constant 0 : i32
    %c0_i32_1 = arith.constant 0 : i32
    return %c0_i32, %c0_i32_0 : i32, i32
  }
  func.func @transform_8(%arg0: i32) -> (i32, i32) {
    %c0_i32 = arith.constant 0 : i32
    %c0_i32_0 = arith.constant 0 : i32
    %c0_i32_1 = arith.constant 0 : i32
    return %c0_i32, %c0_i32_0 : i32, i32
  }
  func.func @transform_9(%arg0: i32) -> (i32, i32) {
    %c0_i32 = arith.constant 0 : i32
    %c0_i32_0 = arith.constant 0 : i32
    %c0_i32_1 = arith.constant 0 : i32
    return %c0_i32, %c0_i32_0 : i32, i32
  }
  func.func @transform_10(%arg0: i32) -> (i32, i32) {
    %c0_i32 = arith.constant 0 : i32
    %c0_i32_0 = arith.constant 0 : i32
    %c0_i32_1 = arith.constant 0 : i32
    return %c0_i32, %c0_i32_0 : i32, i32
  }
  func.func @transform_11(%arg0: i32) -> (i32, i32) {
    %c0_i32 = arith.constant 0 : i32
    %c0_i32_0 = arith.constant 0 : i32
    %c0_i32_1 = arith.constant 0 : i32
    return %c0_i32, %c0_i32_0 : i32, i32
  }
  func.func @transform_12(%arg0: i32) -> (i32, i32) {
    %c0_i32 = arith.constant 0 : i32
    %c0_i32_0 = arith.constant 0 : i32
    %c0_i32_1 = arith.constant 0 : i32
    return %c0_i32, %c0_i32_0 : i32, i32
  }
  func.func @transform_13(%arg0: i32) -> (i32, i32) {
    %c0_i32 = arith.constant 0 : i32
    %c0_i32_0 = arith.constant 0 : i32
    %c0_i32_1 = arith.constant 0 : i32
    return %c0_i32, %c0_i32_0 : i32, i32
  }
}

</mosaic_0001>

<bundles_post_ra>
// kernel: tpu_custom_call.1
= control target key start
LH: loop header
LB: loop body
LE: loop exit
PB: predicated region body
PF: predicated region fallthrough
CT: control target
= control target key end

     0   :  { %19 = vsyncpa [#allocation4], 0  ;;  %s1246_s0 = inlined_call_operand.vmem [shape: s32[32,1], index: 0, kind: input, shape index: {}]   ;;  %s1247_s1 = inlined_call_operand.vmem [shape: s32[1,32], index: 1, kind: input, shape index: {}]   ;;  %s1248_s2 = inlined_call_operand.vmem [shape: f32[16,128], index: 2, kind: input, shape index: {}]   ;;  %s1249_s3 = inlined_call_operand.vmem [shape: f32[32,2], index: 3, kind: input, shape index: {}]   ;;  %s1250_s4 = inlined_call_operand.vmem [shape: f32[2,128], index: 4, kind: input, shape index: {}]   ;;  %s1251_s5 = inlined_call_operand.vmem [shape: f32[1,128], index: 5, kind: input, shape index: {}]   ;;  %s1252_s6 = inlined_call_operand.<no memory space> [shape: f32[1,1], index: 6, kind: input, shape index: {}]   ;;  %s1253_s7 = inlined_call_operand.hbm [shape: f32[128,128], index: 7, kind: input, shape index: {}]   ;;  %s1254_s8 = inlined_call_operand.vmem [shape: f32[1,128], index: 8, kind: input, shape index: {}]   ;;  %s1255_s9 = inlined_call_operand.hbm [shape: f32[128,128], index: 9, kind: input, shape index: {}]   ;;  %s1256_s10 = inlined_call_operand.vmem [shape: f32[1,128], index: 10, kind: input, shape index: {}]   ;;  %s1257_s11 = inlined_call_operand.hbm [shape: f32[128,128], index: 11, kind: input, shape index: {}]   ;;  %s1258_s12 = inlined_call_operand.vmem [shape: f32[1,128], index: 12, kind: input, shape index: {}]   ;;  %s1259_s13 = inlined_call_operand.hbm [shape: f32[16,128], index: 13, kind: output, shape index: {}]  }
   0x1   :  { %20 = vsyncpa [#allocation7], 0 }
   0x2   :  { %21 = vsyncpa [#allocation5], 0  ;;  %s1031_s25 = smov [#allocation6]   ;;  %s1032_s27 = smov [#allocation3]  }
   0x3   :  { %s55_s26 = sshll.u32 %s1031_s25, 4  ;;  %s41_s28 = sshll.u32 %s1032_s27, 4  ;;  %s56_s26 = int_to_ptr.vmem [resolvable:$true] %s55_s26  ;;  %s1111_s28 = int_to_ptr.vmem [resolvable:$true] %s41_s28 }
   0x4   :  { %s937_s14 = scalar_lea.hbm %s1255_s9, 2048 }
   0x5   :  { %p938_p0 = scmp.ne.s32.totalorder %s1255_s9, %s937_s14  ;;  %p941_p1 = scmp.lt.u32.totalorder %s937_s14, %s1255_s9 }
   0x7   :  { %p943_p2 = pnand %p941_p1, %p938_p0 }
   0x9   :  { %946 = shalt.err (!%p943_p2)
}
   0xa   :  { %s947_s19 = scalar_lea.vmem %s56_s26, 2048  ;;  %p952_p4 = scmp.lt.s32.totalorder %s56_s26, %s56_s26 }
   0xb   :  { %p948_p3 = scmp.ne.s32.totalorder %s56_s26, %s947_s19  ;;  %p953_p5 = scmp.lt.s32.totalorder %s947_s19, %s947_s19 }
   0xd   :  { %p954_p6 = por %p953_p5, %p952_p4 }
   0xf   :  { %p955_p7 = pnand %p954_p6, %p948_p3 }
  0x11   :  { %958 = shalt.err (!%p955_p7)
}
  0x12   :  { %s1033_s20 = smov 128   ;;  %s1034_s21 = smov 8  }
  0x13   :  { %61 = dma.hbm_to_vmem [thread:$0]  %s1255_s9, 2048, %s56_s26, [#allocation7], %s1033_s20, %s1033_s20, %s1034_s21  }
  0x14   :  { %s959_s27 = scalar_lea.hbm %s1253_s7, 2048 }
  0x15   :  { %p960_p8 = scmp.ne.s32.totalorder %s1253_s7, %s959_s27  ;;  %p963_p9 = scmp.lt.u32.totalorder %s959_s27, %s1253_s7 }
  0x17   :  { %p965_p10 = pnand %p963_p9, %p960_p8 }
  0x19   :  { %968 = shalt.err (!%p965_p10)
}
  0x1a   :  { %s969_s16 = scalar_lea.vmem %s1111_s28, 2048  ;;  %p974_p12 = scmp.lt.s32.totalorder %s1111_s28, %s1111_s28 }
  0x1b   :  { %p970_p11 = scmp.ne.s32.totalorder %s1111_s28, %s969_s16  ;;  %p975_p13 = scmp.lt.s32.totalorder %s969_s16, %s969_s16 }
  0x1d   :  { %p976_p0 = por %p975_p13, %p974_p12 }
  0x1f   :  { %p977_p1 = pnand %p976_p0, %p970_p11 }
  0x21   :  { %980 = shalt.err (!%p977_p1)
}
  0x22   :  { %47 = dma.hbm_to_vmem [thread:$0]  %s1253_s7, 2048, %s1111_s28, [#allocation4], %s1033_s20, %s1033_s20, %s1034_s21  }
  0x23   :  { %s1035_s17 = smov [#allocation8]   ;;  %s981_s23 = scalar_lea.hbm %s1257_s11, 2048 }
  0x24   :  { %s69_s18 = sshll.u32 %s1035_s17, 4  ;;  %p982_p2 = scmp.ne.s32.totalorder %s1257_s11, %s981_s23  ;;  %s70_s18 = int_to_ptr.vmem [resolvable:$true] %s69_s18 }
  0x25   :  { %p985_p3 = scmp.lt.u32.totalorder %s981_s23, %s1257_s11 }
  0x27   :  { %p987_p4 = pnand %p985_p3, %p982_p2 }
  0x29   :  { %990 = shalt.err (!%p987_p4)
}
  0x2a   :  { %s991_s30 = scalar_lea.vmem %s70_s18, 2048  ;;  %p996_p6 = scmp.lt.s32.totalorder %s70_s18, %s70_s18 }
  0x2b   :  { %p992_p5 = scmp.ne.s32.totalorder %s70_s18, %s991_s30  ;;  %p997_p7 = scmp.lt.s32.totalorder %s991_s30, %s991_s30 }
  0x2d   :  { %p998_p8 = por %p997_p7, %p996_p6 }
  0x2f   :  { %p999_p9 = pnand %p998_p8, %p992_p5 }
  0x31   :  { %1002 = shalt.err (!%p999_p9)
}
  0x32   :  { %75 = dma.hbm_to_vmem [thread:$0]  %s1257_s11, 2048, %s70_s18, [#allocation7], %s1033_s20, %s1033_s20, %s1034_s21  }
  0x33   :  { %1025 = dma.done.wait [#allocation4], 2048  }
  0x34   :  { %1026 = vsyncadd [#allocation4], 4294965248 }
  0x35   :  { %1027 = dma.done.wait [#allocation7], 4096  }
  0x36   :  { %1028 = vsyncadd [#allocation7], 4294963200  ;;  %v1036_v0 = vmov 0   ;;  %v92_v1 = vld [vmem:[%s1246_s0 + $0x10] sm:$0xff]  ;;  %v90_v2 = vld [vmem:[%s1246_s0] sm:$0xff]  ;;  %v1037_v9 = vmov 0.0   ;;  %v94_v14 = vlaneseq }
  0x37   :  { %930 = vset.pattern.permute.xlu1 %v1036_v0  ;;  %929 = vset.pattern.permute.xlu0 %v1036_v0  ;;  %v93_v3 = vld [vmem:[%s1246_s0 + $0x18] sm:$0xff]  ;;  %v91_v4 = vld [vmem:[%s1246_s0 + $0x8] sm:$0xff]  ;;  %v1178_v5 = vld [vmem:[%s1248_s2] sm:$0xff]  ;;  %v1038_v10 = vmov 1   ;;  %vm191_vm4 = vcmask 130048   ;;  %vm1039_vm5 = vmmov 0  }
  0x38   :  { %103 = vperm.xlu1 %930, %v92_v1   ;;  %97 = vperm.xlu0 %929, %v90_v2   ;;  %v1183_v6 = vld [vmem:[%s1248_s2 + $0x8] sm:$0xff]  ;;  %v121_v11 = vld [vmem:[%s1249_s3 + $0x10] sm:$0xff]  ;;  %v119_v12 = vld [vmem:[%s1249_s3] sm:$0xff]  ;;  %v95_v15 = vand.u32 127, %v94_v14  ;;  %v145_v51 = vshrl.u32 %v94_v14, 7  ;;  %vm271_vm8 = vcmask 261120  }
  0x39   :  { %v118_v7 = vpack.c.bf16 %v1183_v6, %v1178_v5  ;;  %v120_v8 = vld [vmem:[%s1249_s3 + $0x8] sm:$0xff]  ;;  %v122_v13 = vld [vmem:[%s1249_s3 + $0x18] sm:$0xff]  ;;  %v316_v26 = vld [vmem:[#allocation3] sm:$0xff]  ;;  %s267_s26 = sadd.f32 1.0, %s1252_s6  ;;  %s1040_s22 = smov [#allocation9]  }
  0x3a   :  { %v317_v27 = vld [vmem:[#allocation3 + $0x8] sm:$0xff]  ;;  %v318_v28 = vld [vmem:[#allocation3 + $0x10] sm:$0xff]  ;;  %v319_v30 = vld [vmem:[#allocation3 + $0x18] sm:$0xff]  ;;  %v146_v54 = vsub.s32 0, %v145_v51  ;;  %v170_v55 = vsub.s32 1, %v145_v51  ;;  %s623_s23 = sshll.u32 %s1040_s22, 4  ;;  %s624_s23 = int_to_ptr.vmem [resolvable:$true] %s623_s23 }
  0x3b   :  { %704 = vmatprep.subr.bf16.mxu1 %v118_v7  ;;  %v823_v29 = vpack.c.bf16 %v317_v27, %v316_v26  ;;  %v827_v31 = vpack.c.bf16 %v319_v30, %v318_v28  ;;  %v320_v32 = vld [vmem:[#allocation3 + $0x20] sm:$0xff]  ;;  %v321_v33 = vld [vmem:[#allocation3 + $0x28] sm:$0xff]  ;;  %v322_v35 = vld [vmem:[#allocation3 + $0x30] sm:$0xff]  ;;  %p1008_p11 = scmp.lt.s32.totalorder %s624_s23, %s624_s23 }
  0x3c   :  { %106 = vperm.xlu1 %930, %v93_v3   ;;  %100 = vperm.xlu0 %929, %v91_v4   ;;  %v831_v34 = vpack.c.bf16 %v321_v33, %v320_v32  ;;  %v323_v36 = vld [vmem:[#allocation3 + $0x38] sm:$0xff]  ;;  %v324_v38 = vld [vmem:[#allocation3 + $0x40] sm:$0xff]  ;;  %v325_v39 = vld [vmem:[#allocation3 + $0x48] sm:$0xff] }
  0x3d   :  { %705 = vmatpush3.bf16.msra.mxu1 %v118_v7  ;;  %824 = vmatprep.subr.bf16.mxu0 %v823_v29  ;;  %v835_v37 = vpack.c.bf16 %v323_v36, %v322_v35  ;;  %v839_v40 = vpack.c.bf16 %v325_v39, %v324_v38  ;;  %v326_v41 = vld [vmem:[#allocation3 + $0x50] sm:$0xff]  ;;  %v327_v42 = vld [vmem:[#allocation3 + $0x58] sm:$0xff]  ;;  %v328_v44 = vld [vmem:[#allocation3 + $0x60] sm:$0xff] }
  0x3e   :  { %710 = vmatprep.subr.bf16.mxu1 %v1037_v9  ;;  %826 = vmatpush3.bf16.msra.mxu0 %v823_v29  ;;  %v843_v43 = vpack.c.bf16 %v327_v42, %v326_v41  ;;  %v329_v45 = vld [vmem:[#allocation3 + $0x68] sm:$0xff]  ;;  %v123_v56 = vld [vmem:[%s1250_s4] sm:$0x3]  ;;  %v330_v36 = vld [vmem:[#allocation3 + $0x70] sm:$0xff] }
  0x3f   :  { %828 = vmatprep.subr.bf16.mxu0 %v827_v31  ;;  %v847_v46 = vpack.c.bf16 %v329_v45, %v328_v44  ;;  %v147_v59 = vrot.slane %v123_v56, %v146_v54  ;;  %v171_v60 = vrot.slane %v123_v56, %v170_v55  ;;  %v639_v26 = vld [vmem:[%s1247_s1] ss:$0 sm:$0xff]  ;;  %v418_v41 = vld [vmem:[#allocation6 + $0x10] sm:$0xff]  ;;  %v427_v54 = vld [vmem:[#allocation6 + $0x58] sm:$0xff] }
  0x40   :  { %131 = vperm.xlu1 %930, %v120_v8   ;;  %931 = vset.pattern.permute.xlu0 %v1038_v10  ;;  %vm259_vm6 = vcmp.eq.s32.totalorder %v145_v51, %v639_v26  ;;  %v416_v39 = vld [vmem:[#allocation6] sm:$0xff] }
  0x41   :  { %153 = vperm.xlu0 %931, %v119_v12   ;;  %v261_v33 = vsel %vm259_vm6, 1.0, %v1037_v9  ;;  %v420_v45 = vld [vmem:[#allocation6 + $0x20] sm:$0xff] }
  0x42   :  { %830 = vmatpush3.bf16.msra.mxu0 %v827_v31  ;;  %v428_v56 = vld [vmem:[#allocation6 + $0x60] sm:$0xff] }
  0x43   :  { %832 = vmatprep.subr.bf16.mxu0 %v831_v34 }
  0x44   :  { %933 = vset.pattern.permute.xlu1 %v1038_v10 }
  0x45   :  { %157 = vperm.xlu1 %933, %v120_v8   ;;  %932 = vset.pattern.permute.xlu0 %v1036_v0 }
  0x46   :  { %126 = vperm.xlu0 %932, %v119_v12   ;;  %834 = vmatpush3.bf16.msra.mxu0 %v831_v34  ;;  %v636_v12 = vld [vmem:[%s1251_s5] ss:$0 sm:$0xff] }
  0x47   :  { %836 = vmatprep.subr.bf16.mxu0 %v835_v37 }
  0x49   :  { %934 = vset.pattern.permute.xlu1 %v1036_v0 }
  0x4a   :  { %136 = vperm.xlu1 %934, %v121_v11   ;;  %141 = vperm.xlu0 %932, %v122_v13  }
  0x4b   :  { %838 = vmatpush3.bf16.msra.mxu0 %v835_v37  ;;  %v331_v37 = vld [vmem:[#allocation3 + $0x78] sm:$0xff] }
  0x4c   :  { %840 = vmatprep.subr.bf16.mxu0 %v839_v40  ;;  %v851_v38 = vpack.c.bf16 %v331_v37, %v330_v36  ;;  %v530_v36 = vld [vmem:[#allocation8 + $0x70] sm:$0xff]  ;;  %v531_v37 = vld [vmem:[#allocation8 + $0x78] sm:$0xff] }
  0x4e   :  { %935 = vset.pattern.permute.xlu1 %v1038_v10  ;;  %936 = vset.pattern.permute.xlu0 %v1038_v10 }
  0x4f   :  { %161 = vperm.xlu1 %935, %v121_v11   ;;  %842 = vmatpush3.bf16.msra.mxu0 %v839_v40  ;;  %v417_v40 = vld [vmem:[#allocation6 + $0x8] sm:$0xff] }
  0x50   :  { %844 = vmatprep.subr.bf16.mxu0 %v843_v43  ;;  %v855_v42 = vpack.c.bf16 %v417_v40, %v416_v39  ;;  %v642_v39 = vld [vmem:[%s1256_s10] ss:$0 sm:$0xff]  ;;  %s1003_s10 = scalar_lea.vmem %s624_s23, 256 }
  0x51   :  { %p1004_p10 = scmp.ne.s32.totalorder %s624_s23, %s1003_s10  ;;  %p1009_p12 = scmp.lt.s32.totalorder %s1003_s10, %s1003_s10 }
  0x53   :  { %165 = vperm.xlu1 %935, %v122_v13   ;;  %846 = vmatpush3.bf16.msra.mxu0 %v843_v43  ;;  %v419_v43 = vld [vmem:[#allocation6 + $0x18] sm:$0xff]  ;;  %p1010_p13 = por %p1009_p12, %p1008_p11 }
  0x54   :  { %848 = vmatprep.subr.bf16.mxu0 %v847_v46  ;;  %v859_v44 = vpack.c.bf16 %v419_v43, %v418_v41 }
  0x55   :  { %p1011_p0 = pnand %p1010_p13, %p1004_p10 }
  0x57   :  { %850 = vmatpush3.bf16.msra.mxu0 %v847_v46  ;;  %v421_v46 = vld [vmem:[#allocation6 + $0x28] sm:$0xff] }
  0x58   :  { %852 = vmatprep.subr.bf16.mxu0 %v851_v38 }
  0x5b   :  { %854 = vmatpush3.bf16.msra.mxu0 %v851_v38  ;;  %v915_v38 = vpack.c.bf16 %v531_v37, %v530_v36 }
  0xb7   :  { %v104_v16 = vpop.permute.xlu1 %103  ;;  %v98_v17 = vpop.permute.xlu0 %97 }
  0xb8   :  { %vm110_vm0 = vcmp.eq.s32.totalorder %v95_v15, %v104_v16  ;;  %vm108_vm1 = vcmp.eq.s32.totalorder %v95_v15, %v98_v17 }
  0xb9   :  { %v114_v20 = vsel %vm110_vm0, 1.0, %v1037_v9  ;;  %v112_v21 = vsel %vm108_vm1, 1.0, %v1037_v9 }
  0xbb   :  { %v107_v18 = vpop.permute.xlu1 %106  ;;  %v101_v19 = vpop.permute.xlu0 %100 }
  0xbc   :  { %vm111_vm2 = vcmp.eq.s32.totalorder %v95_v15, %v107_v18  ;;  %vm109_vm3 = vcmp.eq.s32.totalorder %v95_v15, %v101_v19 }
  0xbd   :  { %v115_v22 = vsel %vm111_vm2, 1.0, %v1037_v9  ;;  %v113_v23 = vsel %vm109_vm3, 1.0, %v1037_v9 }
  0xbe   :  { %v117_v24 = vpack.c.bf16 %v115_v22, %v114_v20  ;;  %v116_v25 = vpack.c.bf16 %v113_v23, %v112_v21 }
  0xbf   :  { %v132_v47 = vpop.permute.xlu1 %131 }
  0xc0   :  { %706 = vmatprep.mubr.msk.bf16.mxu1 %vm191_vm4, %v116_v25  ;;  %v154_v50 = vpop.permute.xlu0 %153  ;;  %v149_v8 = vmul.f32 %v147_v59, %v132_v47  ;;  %v422_v47 = vld [vmem:[#allocation6 + $0x30] sm:$0xff] }
  0xc1   :  { %707 = vmatmul.mubr.msk.bf16.vlgmr.msra.gmra.mrb[0].mxu1 %vm191_vm4, %v117_v24  ;;  %v172_v1 = vmul.f32 %v171_v60, %v154_v50  ;;  %v254_v24 = vadd.s32 8, %v145_v51  ;;  %v424_v50 = vld [vmem:[#allocation6 + $0x40] sm:$0xff]  ;;  %v425_v51 = vld [vmem:[#allocation6 + $0x48] sm:$0xff] }
  0xc2   :  { %714 = vmatprep.mubr.msk.bf16.mxu1 %vm1039_vm5, %v1037_v9 }
  0xc3   :  { %vm260_vm7 = vcmp.eq.s32.totalorder %v254_v24, %v639_v26  ;;  %v527_v24 = vld [vmem:[#allocation8 + $0x58] sm:$0xff]  ;;  %v528_v26 = vld [vmem:[#allocation8 + $0x60] sm:$0xff] }
  0xc4   :  { %v158_v48 = vpop.permute.xlu1 %157  ;;  %v262_v34 = vsel %vm260_vm7, 1.0, %v1037_v9 }
  0xc5   :  { %v127_v53 = vpop.permute.xlu0 %126  ;;  %v173_v3 = vmul.f32 %v171_v60, %v158_v48  ;;  %v263_v35 = vpack.c.bf16 %v262_v34, %v261_v33  ;;  %v423_v48 = vld [vmem:[#allocation6 + $0x38] sm:$0xff] }
  0xc6   :  { %v148_v2 = vmul.f32 %v147_v59, %v127_v53  ;;  %v426_v53 = vld [vmem:[#allocation6 + $0x50] sm:$0xff] }
  0xc7   :  { %v177_v11 = vadd.f32 %v173_v3, %v149_v8  ;;  %v875_v55 = vpack.c.bf16 %v427_v54, %v426_v53 }
  0xc8   :  { %v176_v10 = vadd.f32 %v172_v1, %v148_v2 }
  0xc9   :  { %v137_v49 = vpop.permute.xlu1 %136  ;;  %v142_v58 = vpop.permute.xlu0 %141  ;;  %v188_v21 = vadd.f32 %v636_v12, %v177_v11  ;;  %v517_v11 = vld [vmem:[#allocation8 + $0x8] sm:$0xff] }
  0xca   :  { %v150_v61 = vmul.f32 %v147_v59, %v137_v49  ;;  %v151_v0 = vmul.f32 %v147_v59, %v142_v58  ;;  %v187_v16 = vadd.f32 %v636_v12, %v176_v10  ;;  %v867_v49 = vpack.c.bf16 %v423_v48, %v422_v47  ;;  %v516_v10 = vld [vmem:[#allocation8] sm:$0xff] }
  0xcb   :  { %v268_v59 = vstv %s267_s26 }
  0xce   :  { %v162_v52 = vpop.permute.xlu1 %161 }
  0xcf   :  { %v174_v62 = vmul.f32 %v171_v60, %v162_v52  ;;  %v871_v52 = vpack.c.bf16 %v425_v51, %v424_v50 }
  0xd1   :  { %v178_v4 = vadd.f32 %v174_v62, %v150_v61  ;;  %v270_v61 = vmul.f32 %v268_v59, %v1183_v6  ;;  %v520_v6 = vld [vmem:[#allocation8 + $0x20] sm:$0xff] }
  0xd2   :  { %v166_v57 = vpop.permute.xlu1 %165 }
  0xd3   :  { %v175_v63 = vmul.f32 %v171_v60, %v166_v57  ;;  %v189_v13 = vadd.f32 %v636_v12, %v178_v4  ;;  %v429_v57 = vld [vmem:[#allocation6 + $0x68] sm:$0xff]  ;;  %v269_v60 = vmul.f32 %v268_v59, %v1178_v5  ;;  %v430_v4 = vld [vmem:[#allocation6 + $0x70] sm:$0xff]  ;;  %v519_v5 = vld [vmem:[#allocation8 + $0x18] sm:$0xff] }
  0xd4   :  { %v879_v58 = vpack.c.bf16 %v429_v57, %v428_v56 }
  0xd5   :  { %v179_v7 = vadd.f32 %v175_v63, %v151_v0 }
  0xd7   :  { %v190_v14 = vadd.f32 %v636_v12, %v179_v7  ;;  %v431_v7 = vld [vmem:[#allocation6 + $0x78] sm:$0xff]  ;;  %v518_v12 = vld [vmem:[#allocation8 + $0x10] sm:$0xff] }
  0xd8   :  { %v883_v8 = vpack.c.bf16 %v431_v7, %v430_v4 }
 0x194   :  { %v708_v15 = vpop.f32.mrb[0].mxu1 }
 0x195   :  { %v241_v17 = vadd.f32 %v708_v15, %v189_v13  ;;  %v232_v18 = vpop.f32.mrb[1].mxu1  ;;  %v887_v13 = vpack.c.bf16 %v517_v11, %v516_v10  ;;  %v521_v15 = vld [vmem:[#allocation8 + $0x28] sm:$0xff] }
 0x196   :  { %v233_v19 = vadd.f32 %v232_v18, %v187_v16  ;;  %v709_v20 = vpop.f32.mrb[2].mxu1  ;;  %v895_v16 = vpack.c.bf16 %v521_v15, %v520_v6  ;;  %v523_v18 = vld [vmem:[#allocation8 + $0x38] sm:$0xff] }
 0x197   :  { %v244_v22 = vadd.f32 %v709_v20, %v190_v14  ;;  %v235_v23 = vpop.f32.mrb[3].mxu1  ;;  %v249_v27 = vmax.f32 %v241_v17, 0.0  ;;  %v891_v14 = vpack.c.bf16 %v519_v5, %v518_v12  ;;  %888 = vmatprep.subr.bf16.mxu0 %v887_v13  ;;  %v522_v17 = vld [vmem:[#allocation8 + $0x30] sm:$0xff]  ;;  %v524_v20 = vld [vmem:[#allocation8 + $0x40] sm:$0xff] }
 0x198   :  { %v236_v25 = vadd.f32 %v235_v23, %v188_v21  ;;  %v247_v29 = vmax.f32 %v233_v19, 0.0  ;;  %v899_v19 = vpack.c.bf16 %v523_v18, %v522_v17  ;;  %v525_v21 = vld [vmem:[#allocation8 + $0x48] sm:$0xff]  ;;  %v526_v23 = vld [vmem:[#allocation8 + $0x50] sm:$0xff] }
 0x199   :  { %v250_v28 = vmax.f32 %v244_v22, 0.0  ;;  %v903_v22 = vpack.c.bf16 %v525_v21, %v524_v20 }
 0x19a   :  { %v248_v30 = vmax.f32 %v236_v25, 0.0  ;;  %v907_v25 = vpack.c.bf16 %v527_v24, %v526_v23 }
 0x19b   :  { %v265_v31 = vpack.c.bf16 %v250_v28, %v249_v27  ;;  %v529_v27 = vld [vmem:[#allocation8 + $0x68] sm:$0xff] }
 0x19c   :  { %v264_v32 = vpack.c.bf16 %v248_v30, %v247_v29  ;;  %v911_v28 = vpack.c.bf16 %v529_v27, %v528_v26  ;;  %v641_v29 = vld [vmem:[%s1254_s8] ss:$0 sm:$0xff] }
 0x19e   :  { %711 = vmatpush3.bf16.msra.mxu1 %v264_v32 }
 0x19f   :  { %712 = vmatprep.subr.bf16.mxu1 %v1037_v9  ;;  %v863_v9 = vpack.c.bf16 %v421_v46, %v420_v45  ;;  %v643_v46 = vld [vmem:[%s1258_s12] ss:$0 sm:$0xff] }
 0x1a2   :  { %713 = vmatpush3.bf16.msra.mxu1 %v265_v31 }
 0x1a3   :  { %856 = vmatprep.subr.bf16.mxu1 %v855_v42 }
 0x1a5   :  { %715 = vmatmul.mubr.msk.bf16.vlgmr.msra.gmra.mrb[4].mxu1 %vm271_vm8, %v263_v35 }
 0x1a6   :  { %858 = vmatpush3.bf16.msra.mxu1 %v855_v42 }
 0x1a7   :  { %860 = vmatprep.subr.bf16.mxu1 %v859_v44 }
 0x1aa   :  { %862 = vmatpush3.bf16.msra.mxu1 %v859_v44 }
 0x1ab   :  { %864 = vmatprep.subr.bf16.mxu1 %v863_v9 }
 0x1ae   :  { %866 = vmatpush3.bf16.msra.mxu1 %v863_v9 }
 0x1af   :  { %868 = vmatprep.subr.bf16.mxu1 %v867_v49 }
 0x1b2   :  { %870 = vmatpush3.bf16.msra.mxu1 %v867_v49 }
 0x1b3   :  { %872 = vmatprep.subr.bf16.mxu1 %v871_v52 }
 0x1b6   :  { %874 = vmatpush3.bf16.msra.mxu1 %v871_v52 }
 0x1b7   :  { %876 = vmatprep.subr.bf16.mxu1 %v875_v55 }
 0x1ba   :  { %878 = vmatpush3.bf16.msra.mxu1 %v875_v55 }
 0x1bb   :  { %880 = vmatprep.subr.bf16.mxu1 %v879_v58 }
 0x1be   :  { %882 = vmatpush3.bf16.msra.mxu1 %v879_v58 }
 0x1bf   :  { %884 = vmatprep.subr.bf16.mxu1 %v883_v8 }
 0x1c2   :  { %886 = vmatpush3.bf16.msra.mxu1 %v883_v8 }
 0x278   :  { %v309_v62 = vpop.f32.mrb[4].mxu1 }
 0x279   :  { %v716_v63 = vpop.f32.mrb[5].mxu1  ;;  %v310_v0 = vadd.f32 %v309_v62, %v269_v60 }
 0x27a   :  { %v312_v1 = vpop.f32.mrb[6].mxu1 }
 0x27b   :  { %v313_v2 = vadd.f32 %v312_v1, %v270_v61  ;;  %v717_v3 = vpop.f32.mrb[7].mxu1  ;;  %750 = vmatprep.mubr.f32.mxu0 %v310_v0 }
 0x27d   :  { %751 = vmatmul.mubr.f32.vlgmr.msra.gmra.mrb[0].mxu0 %v313_v2 }
 0x27e   :  { %890 = vmatpush3.bf16.msra.mxu0 %v887_v13 }
 0x27f   :  { %892 = vmatprep.subr.bf16.mxu0 %v891_v14 }
 0x282   :  { %894 = vmatpush3.bf16.msra.mxu0 %v891_v14 }
 0x283   :  { %896 = vmatprep.subr.bf16.mxu0 %v895_v16 }
 0x286   :  { %898 = vmatpush3.bf16.msra.mxu0 %v895_v16 }
 0x287   :  { %900 = vmatprep.subr.bf16.mxu0 %v899_v19 }
 0x28a   :  { %902 = vmatpush3.bf16.msra.mxu0 %v899_v19 }
 0x28b   :  { %904 = vmatprep.subr.bf16.mxu0 %v903_v22 }
 0x28e   :  { %906 = vmatpush3.bf16.msra.mxu0 %v903_v22 }
 0x28f   :  { %908 = vmatprep.subr.bf16.mxu0 %v907_v25 }
 0x292   :  { %910 = vmatpush3.bf16.msra.mxu0 %v907_v25 }
 0x293   :  { %912 = vmatprep.subr.bf16.mxu0 %v911_v28 }
 0x296   :  { %914 = vmatpush3.bf16.msra.mxu0 %v911_v28 }
 0x297   :  { %916 = vmatprep.subr.bf16.mxu0 %v915_v38 }
 0x29a   :  { %918 = vmatpush3.bf16.msra.mxu0 %v915_v38 }
 0x350   :  { %v752_v30 = vpop.f32.mrb[0].mxu0 }
 0x351   :  { %v411_v31 = vadd.f32 %v752_v30, %v641_v29  ;;  %v405_v32 = vpop.f32.mrb[1].mxu0 }
 0x352   :  { %v406_v33 = vadd.f32 %v641_v29, %v405_v32 }
 0x353   :  { %v415_v35 = vmax.f32 %v411_v31, 0.0 }
 0x354   :  { %v414_v34 = vmax.f32 %v406_v33, 0.0 }
 0x356   :  { %785 = vmatprep.mubr.f32.mxu1 %v414_v34 }
 0x357   :  { %786 = vmatmul.mubr.f32.vlgmr.msra.gmra.mrb[8].mxu1 %v415_v35 }
 0x42a   :  { %v787_v40 = vpop.f32.mrb[8].mxu1 }
 0x42b   :  { %v511_v41 = vadd.f32 %v787_v40, %v642_v39  ;;  %v505_v42 = vpop.f32.mrb[9].mxu1 }
 0x42c   :  { %v506_v43 = vadd.f32 %v642_v39, %v505_v42 }
 0x42d   :  { %v515_v45 = vmax.f32 %v511_v41, 0.0 }
 0x42e   :  { %v514_v44 = vmax.f32 %v506_v43, 0.0 }
 0x430   :  { %820 = vmatprep.mubr.f32.mxu0 %v514_v44 }
 0x431   :  { %821 = vmatmul.mubr.f32.vlgmr.msra.gmra.mrb[2].mxu0 %v515_v45 }
 0x504   :  { %v822_v9 = vpop.f32.mrb[2].mxu0 }
 0x505   :  { %v611_v47 = vadd.f32 %v822_v9, %v643_v46  ;;  %v605_v48 = vpop.f32.mrb[3].mxu0 }
 0x506   :  { %v606_v49 = vadd.f32 %v643_v46, %v605_v48 }
 0x507   :  { %v615_v50 = vmax.f32 %v611_v47, 0.0 }
 0x508   :  { %v614_v51 = vmax.f32 %v606_v49, 0.0 }
 0x509   :  { %617 = vst [vmem:[#allocation9 + $0x8] sm:$0xff] %v615_v50 }
 0x50a   :  { %616 = vst [vmem:[#allocation9] sm:$0xff] %v614_v51 }
 0x50b   :  { %1014 = shalt.err (!%p1011_p0)
}
 0x50c   :  { %s1015_s25 = scalar_lea.hbm %s1259_s13, 256 }
 0x50d   :  { %p1016_p1 = scmp.ne.s32.totalorder %s1259_s13, %s1015_s25  ;;  %p1019_p2 = scmp.lt.u32.totalorder %s1015_s25, %s1259_s13 }
 0x50f   :  { %p1021_p3 = pnand %p1019_p2, %p1016_p1 }
 0x511   :  { %1024 = shalt.err (!%p1021_p3)
}
 0x512   :  { %629 = dma.vmem_to_hbm [thread:$0]  %s624_s23, 256, %s1259_s13, [#allocation5], %s1033_s20, %s1033_s20, %s1034_s21  }
 0x513   :  { %1029 = dma.done.wait [#allocation5], 256  }
 0x514   :  { %1030 = vsyncadd [#allocation5], 4294967040 }
 0x515   :  { %633 = vsyncpa [#allocation4], 1 }
 0x516   :  { %634 = vsyncpa [#allocation7], 1 }
 0x517   :  { %635 = vsyncpa [#allocation5], 1 }

</bundles_post_ra>
